<compile_context>
chip_gen: v5e
topology: v5e:2x2
jax: 0.10.0
libtpu: 0.0.40
codegen_flags: <defaults>
</compile_context>

<pallas_src>
import functools

import jax
import jax.numpy as jnp
from jax.experimental import pallas as pl
from jax.experimental.pallas import tpu as pltpu


def _fused_partial_conv_kernel(kernel_size, plane_w, real_lanes, max_iterations,
                               fw_ref, x_ref, m_ref, ref_ref, out_ref):
    """Runs the full partial-conv interpolation loop for ALL (n, c) planes.

    Packed layout: arrays are (H, L), L = round_up(N*C*W, 128) lanes; plane
    q = n*C + c occupies lane columns [q*W, (q+1)*W).  Lane validity masks
    force padding lanes (>= real_lanes) to stay exactly zero, so they never
    affect results or the termination tests.

      fw_ref : SMEM (K*K,) f32        flattened feature kernel (shared by channels)
      x_ref  : VMEM (H, L) f32        packed `input`
      m_ref  : VMEM (H, L) f32        packed `mask`
      ref_ref: VMEM (H, ref_lanes)    binarized ref_mask in the (n=0,c=0) plane
                                      slot (lanes [0, W)), zero elsewhere
      out_ref: VMEM (H, L) f32        packed final `output`
    """
    K = kernel_size
    W = plane_w
    p = K // 2
    H, L = x_ref.shape
    ref_lanes = ref_ref.shape[1]
    f32 = jnp.float32

    # Feature weights -> loop-invariant scalars (one SMEM read each, hoisted).
    ws = [fw_ref[i] for i in range(K * K)]

    x0 = x_ref[...]
    m0 = m_ref[...]
    refm = ref_ref[...]
    ref_sum = jnp.sum(refm)

    # ---- slim edge-validity masks, computed ONCE before the loop -----------
    # (JAX does not CSE broadcasts; everything here is closed over by the body.)
    row_idx = jax.lax.broadcasted_iota(jnp.int32, (H, 1), 0)        # (H, 1)
    lane_idx = jax.lax.broadcasted_iota(jnp.int32, (1, L), 1)       # (1, L)
    lane_in_plane = lane_idx % W
    is_real = lane_idx < real_lanes                                  # padding stays 0

    row_valid = {}
    lane_valid = {}
    for t in range(-p, p + 1):
        if t != 0:
            row_valid[t] = ((row_idx + t >= 0) & (row_idx + t < H)).astype(f32)
        lane_valid[t] = (is_real & (lane_in_plane + t >= 0)
                         & (lane_in_plane + t < W)).astype(f32)

    # Feature weight folded into the lane mask: one multiply per tap.
    wmask = [[ws[dy * K + dx] * lane_valid[dx - p] for dx in range(K)]
             for dy in range(K)]

    def roll_rows(a, t):      # a[h + t, :] (wrap; caller masks the wrap)
        return a if t == 0 else pltpu.roll(a, shift=(-t) % H, axis=0)

    def roll_lanes(a, t):     # a[:, l + t] (wrap; caller masks the wrap)
        return a if t == 0 else pltpu.roll(a, shift=(-t) % L, axis=1)

    def feature_conv(x):
        """conv2d(x, feature_weight, padding=K//2, groups=C) on packed planes."""
        acc = jnp.zeros((H, L), f32)
        for dy in range(K):
            ty = dy - p
            x_dy = roll_rows(x, ty)
            if ty != 0:
                x_dy = x_dy * row_valid[ty]
            for dx in range(K):
                tx = dx - p
                acc = acc + roll_lanes(x_dy, tx) * wmask[dy][dx]
        return acc

    def mask_conv(m):
        """conv2d(m, ones(K,K), padding=K//2, groups=C): separable box filter."""
        lsum = m                               # center tap (m is 0 on padding)
        for t in range(1, p + 1):
            lsum = lsum + roll_lanes(m, -t) * lane_valid[-t]
            lsum = lsum + roll_lanes(m, t) * lane_valid[t]
        acc = lsum
        for t in range(1, p + 1):
            acc = acc + roll_rows(lsum, -t) * row_valid[-t]
            acc = acc + roll_rows(lsum, t) * row_valid[t]
        return acc

    def cond(carry):
        i, done, _, _, _, _ = carry
        return jnp.logical_and(i < max_iterations, done == 0)

    def body(carry):
        i, _, x, m, _, m_count = carry
        xconv = feature_conv(x)
        mconv = mask_conv(m)
        new_mask = (mconv > 0.0).astype(f32)
        # In-kernel early-exit tests (exact: counts are small integers in f32).
        cov = jnp.sum(new_mask[:, :ref_lanes] * refm)      # plane-0 column only
        new_count = jnp.sum(new_mask)
        stat = cov == ref_sum                              # ref coverage reached
        equal = new_count == m_count                       # mask fixed point
        done = jnp.logical_or(stat, equal).astype(jnp.int32)
        return (i + 1, done, xconv, new_mask, mconv, new_count)

    init = (jnp.int32(0), jnp.int32(0), x0 * m0, m0,       # x0 = input * mask
            jnp.ones((H, L), f32), jnp.sum(m0))
    _, _, x_fin, _, mconv_fin, _ = jax.lax.while_loop(cond, body, init)

    # Division hoisted out of the loop: exactly one masked_fill + divide.
    msum = jnp.where(mconv_fin == 0.0, f32(1.0), mconv_fin)
    out_ref[...] = x_fin / msum


def _pack_planes(a, lanes_pad):
    """(N, C, H, W) -> (H, lanes_pad); plane (n, c) at lanes [(n*C+c)*W, +W)."""
    N, C, H, W = a.shape
    flat = jnp.transpose(a, (2, 0, 1, 3)).reshape(H, N * C * W)
    pad = lanes_pad - N * C * W
    if pad:
        flat = jnp.pad(flat, ((0, 0), (0, pad)))
    return flat


@functools.partial(jax.jit, static_argnames=("kernel_size", "max_iterations"))
def partial_conv_interpolation(inp, mask, ref_mask, feature_weight,
                               kernel_size, max_iterations=20):
    """JAX/Pallas equivalent of PartialConvInterpolation.forward (NCHW)."""
    if max_iterations < 1:
        # PyTorch would raise (output undefined); make the failure explicit.
        raise ValueError("max_iterations must be >= 1")
    N, C, H, W = inp.shape
    # Early-exit tests compare integer counts held in f32; keep them exact.
    assert N * C * H * W < (1 << 24) and H * W < (1 << 24), \
        "mask counts must be exactly representable in float32"

    inp = inp.astype(jnp.float32)
    mask = mask.astype(jnp.float32)
    K = kernel_size
    # Module repeats one (K, K) kernel over channels; accept (K,K) or (C,1,K,K).
    fw_flat = feature_weight.astype(jnp.float32).reshape(-1)[:K * K]

    real_lanes = N * C * W
    lanes_pad = max(128, ((real_lanes + 127) // 128) * 128)   # lane-dense width
    ref_lanes = min(max(128, ((W + 127) // 128) * 128), lanes_pad)

    x_pk = _pack_planes(inp, lanes_pad)
    m_pk = _pack_planes(mask, lanes_pad)
    ref_bin = (ref_mask > 0).astype(jnp.float32)                      # (H, W)
    ref_pk = jnp.zeros((H, ref_lanes), jnp.float32).at[:, :W].set(ref_bin)

    kern = functools.partial(_fused_partial_conv_kernel,
                             K, W, real_lanes, max_iterations)

    # Scoped-VMEM budget sized to the in-kernel live set (inputs + output +
    # 3-array carry + conv temps); clamp to a value safe on v5e/v6e/v7x.
    arr_bytes = H * lanes_pad * 4
    live_estimate = (16 + 2 * K * K) * arr_bytes
    vmem_bytes = int(min(max(live_estimate, 32 << 20), 56 << 20))

    out_pk = pl.pallas_call(
        kern,
        out_shape=jax.ShapeDtypeStruct((H, lanes_pad), jnp.float32),
        in_specs=[
            pl.BlockSpec(memory_space=pltpu.MemorySpace.SMEM),   # feature kernel
            pl.BlockSpec(memory_space=pltpu.MemorySpace.VMEM),   # packed input
            pl.BlockSpec(memory_space=pltpu.MemorySpace.VMEM),   # packed mask
            pl.BlockSpec(memory_space=pltpu.MemorySpace.VMEM),   # packed ref mask
        ],
        out_specs=pl.BlockSpec(memory_space=pltpu.MemorySpace.VMEM),
        compiler_params=pltpu.CompilerParams(vmem_limit_bytes=vmem_bytes),
    )(fw_flat, x_pk, m_pk, ref_pk)

    out = out_pk[:, :real_lanes].reshape(H, N, C, W)
    return jnp.transpose(out, (1, 2, 0, 3))


def _reference_forward(inp, mask, ref_mask, fw, kernel_size, max_iterations=20):
    """Pure-JAX (eager) re-implementation of the PyTorch forward, for testing."""
    K = kernel_size
    p = K // 2
    ones = jnp.ones((K, K), jnp.float32)

    def depthwise(x, ker):   # cross-correlation, padding=K//2, same kernel per ch
        xp = jnp.pad(x, ((0, 0), (0, 0), (p, p), (p, p)))
        out = jnp.zeros_like(x)
        for dy in range(K):
            for dx in range(K):
                out = out + ker[dy, dx] * xp[:, :, dy:dy + x.shape[2],
                                             dx:dx + x.shape[3]]
        return out

    ref_b = (ref_mask > 0).astype(jnp.float32)
    x = inp * mask
    m = mask
    out = jnp.zeros_like(inp)
    for _ in range(max_iterations):
        xconv = depthwise(x, fw)
        mconv = depthwise(m, ones)
        msum = jnp.where(mconv == 0.0, 1.0, mconv)
        out = xconv / msum
        new_mask = (mconv > 0.0).astype(jnp.float32)
        stat = bool(jnp.sum(new_mask[0, 0] * ref_b) == jnp.sum(ref_b))
        if stat or bool(jnp.all(new_mask == m)):
            break
        x = xconv
        m = new_mask
    return out


def _run_case(name, x, mask, ref_mask, fw, K, max_iter, tol=1e-4):
    out = partial_conv_interpolation(x, mask, ref_mask, fw,
                                     kernel_size=K, max_iterations=max_iter)
    out = jax.block_until_ready(out)
    assert out.shape == x.shape and out.dtype == jnp.float32
    ref = _reference_forward(x, mask, ref_mask, fw, K, max_iter)
    err = float(jnp.max(jnp.abs(out - ref)))
    assert err < tol, f"{name}: mismatch vs reference, max abs err {err}"


if __name__ == "__main__":
    key = jax.random.PRNGKey(0)
    k1, k2, k3 = jax.random.split(key, 3)

    K = 3
    feature_weight = jnp.array([[1.0, 2.0, 1.0],
                                [2.0, 4.0, 2.0],
                                [1.0, 2.0, 1.0]], dtype=jnp.float32) / 16.0

    # Case 1: random holes, full-coverage ref mask (coverage break path).
    N, C, H, W = 2, 4, 16, 16
    x1 = jax.random.normal(k1, (N, C, H, W), dtype=jnp.float32)
    m_sp = (jax.random.uniform(k2, (N, 1, H, W)) > 0.7).astype(jnp.float32)
    m1 = jnp.tile(m_sp, (1, C, 1, 1))
    ref1 = jnp.ones((H, W), dtype=jnp.float32)
    _run_case("case1", x1, m1, ref1, feature_weight, K, 20)

    # Case 2: single seed pixel, few iterations -> loop exhausted (no break);
    # exercises the hoisted post-loop divide on the exhaustion path.
    x2 = jax.random.normal(k3, (N, C, H, W), dtype=jnp.float32)
    m2 = jnp.zeros((N, C, H, W), jnp.float32).at[:, :, 7, 9].set(1.0)
    _run_case("case2", x2, m2, ref1, feature_weight, K, 3)

    # Case 3: C=3 so padding lanes exist; each plane all-zero or all-one so the
    # count-based mask fixed-point break fires on the first iteration.
    C3 = 3
    x3 = jax.random.normal(k1, (N, C3, H, W), dtype=jnp.float32)
    m3 = jnp.concatenate([jnp.zeros((1, C3, H, W), jnp.float32),
                          jnp.ones((1, C3, H, W), jnp.float32)], axis=0)
    ref3 = jnp.zeros((H, W), jnp.float32).at[4:12, 4:12].set(1.0)
    _run_case("case3", x3, m3, ref3, feature_weight, K, 20)

    print("KERNEL_OK")
</pallas_src>

<mosaic_0001>
module attributes {stable_mosaic.version = 11 : i64} {
  func.func @_fused_partial_conv_kernel(%arg0: memref<9xf32, #tpu.memory_space<smem>>, %arg1: memref<16x128xf32, #tpu.memory_space<vmem>>, %arg2: memref<16x128xf32, #tpu.memory_space<vmem>>, %arg3: memref<16x128xf32, #tpu.memory_space<vmem>>, %arg4: memref<16x128xf32, #tpu.memory_space<vmem>>) attributes {dimension_semantics = [], scalar_prefetch = 0 : i64, scratch_operands = 0 : i64, tpu.core_type = #tpu.core_type<tc>} {
    %c0 = arith.constant 0 : index
    %0 = memref.load %arg0[%c0] : memref<9xf32, #tpu.memory_space<smem>>
    %c1 = arith.constant 1 : index
    %1 = memref.load %arg0[%c1] : memref<9xf32, #tpu.memory_space<smem>>
    %c2 = arith.constant 2 : index
    %2 = memref.load %arg0[%c2] : memref<9xf32, #tpu.memory_space<smem>>
    %c3 = arith.constant 3 : index
    %3 = memref.load %arg0[%c3] : memref<9xf32, #tpu.memory_space<smem>>
    %c4 = arith.constant 4 : index
    %4 = memref.load %arg0[%c4] : memref<9xf32, #tpu.memory_space<smem>>
    %c5 = arith.constant 5 : index
    %5 = memref.load %arg0[%c5] : memref<9xf32, #tpu.memory_space<smem>>
    %c6 = arith.constant 6 : index
    %6 = memref.load %arg0[%c6] : memref<9xf32, #tpu.memory_space<smem>>
    %c7 = arith.constant 7 : index
    %7 = memref.load %arg0[%c7] : memref<9xf32, #tpu.memory_space<smem>>
    %c8 = arith.constant 8 : index
    %8 = memref.load %arg0[%c8] : memref<9xf32, #tpu.memory_space<smem>>
    %c0_0 = arith.constant 0 : index
    %c0_1 = arith.constant 0 : index
    %9 = vector.load %arg1[%c0_0, %c0_1] : memref<16x128xf32, #tpu.memory_space<vmem>>, vector<16x128xf32>
    %c0_2 = arith.constant 0 : index
    %c0_3 = arith.constant 0 : index
    %10 = vector.load %arg2[%c0_2, %c0_3] : memref<16x128xf32, #tpu.memory_space<vmem>>, vector<16x128xf32>
    %c0_4 = arith.constant 0 : index
    %c0_5 = arith.constant 0 : index
    %11 = vector.load %arg3[%c0_4, %c0_5] : memref<16x128xf32, #tpu.memory_space<vmem>>, vector<16x128xf32>
    %12 = vector.shape_cast %11 : vector<16x128xf32> to vector<1x16x128xf32>
    %cst = arith.constant dense<0.000000e+00> : vector<1xf32>
    %13 = vector.multi_reduction <add>, %12, %cst [1, 2] : vector<1x16x128xf32> to vector<1xf32>
    %14 = vector.shape_cast %13 : vector<1xf32> to vector<1x1x1xf32>
    %15 = vector.extract %14[0, 0, 0] : f32 from vector<1x1x1xf32>
    %16 = tpu.iota {dimensions = array<i32: 0>} : vector<16x1xi32>
    %17 = tpu.iota {dimensions = array<i32: 1>} : vector<1x128xi32>
    %c16_i32 = arith.constant 16 : i32
    %c0_i32 = arith.constant 0 : i32
    %18 = arith.cmpi eq, %c16_i32, %c0_i32 : i32
    %c1_i32 = arith.constant 1 : i32
    %19 = arith.select %18, %c1_i32, %c16_i32 : i32
    %20 = vector.broadcast %19 : i32 to vector<1x128xi32>
    %21 = arith.remsi %17, %20 : vector<1x128xi32>
    %c0_i32_6 = arith.constant 0 : i32
    %22 = vector.broadcast %c0_i32_6 : i32 to vector<1x128xi32>
    %23 = arith.cmpi ne, %21, %22 : vector<1x128xi32>
    %c0_i32_7 = arith.constant 0 : i32
    %24 = vector.broadcast %c0_i32_7 : i32 to vector<1x128xi32>
    %25 = arith.cmpi slt, %21, %24 : vector<1x128xi32>
    %c0_i32_8 = arith.constant 0 : i32
    %26 = arith.cmpi slt, %19, %c0_i32_8 : i32
    %27 = vector.broadcast %26 : i1 to vector<1x128xi1>
    %28 = vector.broadcast %27 : vector<1x128xi1> to vector<1x128xi1>
    %29 = arith.xori %25, %28 : vector<1x128xi1>
    %30 = arith.andi %29, %23 : vector<1x128xi1>
    %31 = vector.broadcast %19 : i32 to vector<1x128xi32>
    %32 = arith.addi %21, %31 : vector<1x128xi32>
    %33 = arith.select %30, %32, %21 : vector<1x128xi1>, vector<1x128xi32>
    %c128_i32 = arith.constant 128 : i32
    %34 = vector.broadcast %c128_i32 : i32 to vector<1x128xi32>
    %35 = arith.cmpi slt, %17, %34 : vector<1x128xi32>
    %c-1_i32 = arith.constant -1 : i32
    %36 = vector.broadcast %c-1_i32 : i32 to vector<16x1xi32>
    %37 = arith.addi %16, %36 : vector<16x1xi32>
    %c0_i32_9 = arith.constant 0 : i32
    %38 = vector.broadcast %c0_i32_9 : i32 to vector<16x1xi32>
    %39 = arith.cmpi sge, %37, %38 : vector<16x1xi32>
    %c-1_i32_10 = arith.constant -1 : i32
    %40 = vector.broadcast %c-1_i32_10 : i32 to vector<16x1xi32>
    %41 = arith.addi %16, %40 : vector<16x1xi32>
    %c16_i32_11 = arith.constant 16 : i32
    %42 = vector.broadcast %c16_i32_11 : i32 to vector<16x1xi32>
    %43 = arith.cmpi slt, %41, %42 : vector<16x1xi32>
    %44 = arith.andi %39, %43 : vector<16x1xi1>
    %45 = arith.extui %44 : vector<16x1xi1> to vector<16x1xi32>
    %46 = arith.sitofp %45 : vector<16x1xi32> to vector<16x1xf32>
    %c-1_i32_12 = arith.constant -1 : i32
    %47 = vector.broadcast %c-1_i32_12 : i32 to vector<1x128xi32>
    %48 = arith.addi %33, %47 : vector<1x128xi32>
    %c0_i32_13 = arith.constant 0 : i32
    %49 = vector.broadcast %c0_i32_13 : i32 to vector<1x128xi32>
    %50 = arith.cmpi sge, %48, %49 : vector<1x128xi32>
    %51 = arith.andi %35, %50 : vector<1x128xi1>
    %c-1_i32_14 = arith.constant -1 : i32
    %52 = vector.broadcast %c-1_i32_14 : i32 to vector<1x128xi32>
    %53 = arith.addi %33, %52 : vector<1x128xi32>
    %c16_i32_15 = arith.constant 16 : i32
    %54 = vector.broadcast %c16_i32_15 : i32 to vector<1x128xi32>
    %55 = arith.cmpi slt, %53, %54 : vector<1x128xi32>
    %56 = arith.andi %51, %55 : vector<1x128xi1>
    %57 = arith.extui %56 : vector<1x128xi1> to vector<1x128xi32>
    %58 = arith.sitofp %57 : vector<1x128xi32> to vector<1x128xf32>
    %c0_i32_16 = arith.constant 0 : i32
    %59 = vector.broadcast %c0_i32_16 : i32 to vector<1x128xi32>
    %60 = arith.addi %33, %59 : vector<1x128xi32>
    %c0_i32_17 = arith.constant 0 : i32
    %61 = vector.broadcast %c0_i32_17 : i32 to vector<1x128xi32>
    %62 = arith.cmpi sge, %60, %61 : vector<1x128xi32>
    %63 = arith.andi %35, %62 : vector<1x128xi1>
    %c0_i32_18 = arith.constant 0 : i32
    %64 = vector.broadcast %c0_i32_18 : i32 to vector<1x128xi32>
    %65 = arith.addi %33, %64 : vector<1x128xi32>
    %c16_i32_19 = arith.constant 16 : i32
    %66 = vector.broadcast %c16_i32_19 : i32 to vector<1x128xi32>
    %67 = arith.cmpi slt, %65, %66 : vector<1x128xi32>
    %68 = arith.andi %63, %67 : vector<1x128xi1>
    %69 = arith.extui %68 : vector<1x128xi1> to vector<1x128xi32>
    %70 = arith.sitofp %69 : vector<1x128xi32> to vector<1x128xf32>
    %c1_i32_20 = arith.constant 1 : i32
    %71 = vector.broadcast %c1_i32_20 : i32 to vector<16x1xi32>
    %72 = arith.addi %16, %71 : vector<16x1xi32>
    %c0_i32_21 = arith.constant 0 : i32
    %73 = vector.broadcast %c0_i32_21 : i32 to vector<16x1xi32>
    %74 = arith.cmpi sge, %72, %73 : vector<16x1xi32>
    %c1_i32_22 = arith.constant 1 : i32
    %75 = vector.broadcast %c1_i32_22 : i32 to vector<16x1xi32>
    %76 = arith.addi %16, %75 : vector<16x1xi32>
    %c16_i32_23 = arith.constant 16 : i32
    %77 = vector.broadcast %c16_i32_23 : i32 to vector<16x1xi32>
    %78 = arith.cmpi slt, %76, %77 : vector<16x1xi32>
    %79 = arith.andi %74, %78 : vector<16x1xi1>
    %80 = arith.extui %79 : vector<16x1xi1> to vector<16x1xi32>
    %81 = arith.sitofp %80 : vector<16x1xi32> to vector<16x1xf32>
    %c1_i32_24 = arith.constant 1 : i32
    %82 = vector.broadcast %c1_i32_24 : i32 to vector<1x128xi32>
    %83 = arith.addi %33, %82 : vector<1x128xi32>
    %c0_i32_25 = arith.constant 0 : i32
    %84 = vector.broadcast %c0_i32_25 : i32 to vector<1x128xi32>
    %85 = arith.cmpi sge, %83, %84 : vector<1x128xi32>
    %86 = arith.andi %35, %85 : vector<1x128xi1>
    %c1_i32_26 = arith.constant 1 : i32
    %87 = vector.broadcast %c1_i32_26 : i32 to vector<1x128xi32>
    %88 = arith.addi %33, %87 : vector<1x128xi32>
    %c16_i32_27 = arith.constant 16 : i32
    %89 = vector.broadcast %c16_i32_27 : i32 to vector<1x128xi32>
    %90 = arith.cmpi slt, %88, %89 : vector<1x128xi32>
    %91 = arith.andi %86, %90 : vector<1x128xi1>
    %92 = arith.extui %91 : vector<1x128xi1> to vector<1x128xi32>
    %93 = arith.sitofp %92 : vector<1x128xi32> to vector<1x128xf32>
    %94 = vector.broadcast %0 : f32 to vector<1x128xf32>
    %95 = arith.mulf %94, %58 : vector<1x128xf32>
    %96 = vector.broadcast %1 : f32 to vector<1x128xf32>
    %97 = arith.mulf %96, %70 : vector<1x128xf32>
    %98 = vector.broadcast %2 : f32 to vector<1x128xf32>
    %99 = arith.mulf %98, %93 : vector<1x128xf32>
    %100 = vector.broadcast %3 : f32 to vector<1x128xf32>
    %101 = arith.mulf %100, %58 : vector<1x128xf32>
    %102 = vector.broadcast %4 : f32 to vector<1x128xf32>
    %103 = arith.mulf %102, %70 : vector<1x128xf32>
    %104 = vector.broadcast %5 : f32 to vector<1x128xf32>
    %105 = arith.mulf %104, %93 : vector<1x128xf32>
    %106 = vector.broadcast %6 : f32 to vector<1x128xf32>
    %107 = arith.mulf %106, %58 : vector<1x128xf32>
    %108 = vector.broadcast %7 : f32 to vector<1x128xf32>
    %109 = arith.mulf %108, %70 : vector<1x128xf32>
    %110 = vector.broadcast %8 : f32 to vector<1x128xf32>
    %111 = arith.mulf %110, %93 : vector<1x128xf32>
    %112 = arith.mulf %9, %10 : vector<16x128xf32>
    %cst_28 = arith.constant 1.000000e+00 : f32
    %113 = vector.broadcast %cst_28 : f32 to vector<16x128xf32>
    %114 = vector.shape_cast %10 : vector<16x128xf32> to vector<1x16x128xf32>
    %cst_29 = arith.constant dense<0.000000e+00> : vector<1xf32>
    %115 = vector.multi_reduction <add>, %114, %cst_29 [1, 2] : vector<1x16x128xf32> to vector<1xf32>
    %116 = vector.shape_cast %115 : vector<1xf32> to vector<1x1x1xf32>
    %117 = vector.extract %116[0, 0, 0] : f32 from vector<1x1x1xf32>
    %c0_i32_30 = arith.constant 0 : i32
    %c0_i32_31 = arith.constant 0 : i32
    %118:6 = scf.while (%arg5 = %c0_i32_30, %arg6 = %c0_i32_31, %arg7 = %112, %arg8 = %10, %arg9 = %113, %arg10 = %117) : (i32, i32, vector<16x128xf32>, vector<16x128xf32>, vector<16x128xf32>, f32) -> (i32, i32, vector<16x128xf32>, vector<16x128xf32>, vector<16x128xf32>, f32) {
      %c20_i32 = arith.constant 20 : i32
      %125 = arith.cmpi slt, %arg5, %c20_i32 : i32
      %c0_i32_36 = arith.constant 0 : i32
      %126 = arith.cmpi eq, %arg6, %c0_i32_36 : i32
      %127 = arith.andi %125, %126 : i1
      scf.condition(%127) %arg5, %arg6, %arg7, %arg8, %arg9, %arg10 : i32, i32, vector<16x128xf32>, vector<16x128xf32>, vector<16x128xf32>, f32
    } do {
    ^bb0(%arg5: i32, %arg6: i32, %arg7: vector<16x128xf32>, %arg8: vector<16x128xf32>, %arg9: vector<16x128xf32>, %arg10: f32):
      %cst_36 = arith.constant 0.000000e+00 : f32
      %125 = vector.broadcast %cst_36 : f32 to vector<16x128xf32>
      %c1_i32_37 = arith.constant 1 : i32
      %126 = tpu.dynamic_rotate %arg7 by %c1_i32_37 dim 0 : vector<16x128xf32>, i32 -> vector<16x128xf32>
      %127 = vector.broadcast %46 : vector<16x1xf32> to vector<16x128xf32>
      %128 = arith.mulf %126, %127 : vector<16x128xf32>
      %c1_i32_38 = arith.constant 1 : i32
      %129 = tpu.dynamic_rotate %128 by %c1_i32_38 dim 1 : vector<16x128xf32>, i32 -> vector<16x128xf32>
      %130 = vector.broadcast %95 : vector<1x128xf32> to vector<16x128xf32>
      %131 = arith.mulf %129, %130 : vector<16x128xf32>
      %132 = arith.addf %125, %131 : vector<16x128xf32>
      %133 = vector.broadcast %97 : vector<1x128xf32> to vector<16x128xf32>
      %134 = arith.mulf %128, %133 : vector<16x128xf32>
      %135 = arith.addf %132, %134 : vector<16x128xf32>
      %c127_i32 = arith.constant 127 : i32
      %136 = tpu.dynamic_rotate %128 by %c127_i32 dim 1 : vector<16x128xf32>, i32 -> vector<16x128xf32>
      %137 = vector.broadcast %99 : vector<1x128xf32> to vector<16x128xf32>
      %138 = arith.mulf %136, %137 : vector<16x128xf32>
      %139 = arith.addf %135, %138 : vector<16x128xf32>
      %c1_i32_39 = arith.constant 1 : i32
      %140 = tpu.dynamic_rotate %arg7 by %c1_i32_39 dim 1 : vector<16x128xf32>, i32 -> vector<16x128xf32>
      %141 = vector.broadcast %101 : vector<1x128xf32> to vector<16x128xf32>
      %142 = arith.mulf %140, %141 : vector<16x128xf32>
      %143 = arith.addf %139, %142 : vector<16x128xf32>
      %144 = vector.broadcast %103 : vector<1x128xf32> to vector<16x128xf32>
      %145 = arith.mulf %arg7, %144 : vector<16x128xf32>
      %146 = arith.addf %143, %145 : vector<16x128xf32>
      %c127_i32_40 = arith.constant 127 : i32
      %147 = tpu.dynamic_rotate %arg7 by %c127_i32_40 dim 1 : vector<16x128xf32>, i32 -> vector<16x128xf32>
      %148 = vector.broadcast %105 : vector<1x128xf32> to vector<16x128xf32>
      %149 = arith.mulf %147, %148 : vector<16x128xf32>
      %150 = arith.addf %146, %149 : vector<16x128xf32>
      %c15_i32 = arith.constant 15 : i32
      %151 = tpu.dynamic_rotate %arg7 by %c15_i32 dim 0 : vector<16x128xf32>, i32 -> vector<16x128xf32>
      %152 = vector.broadcast %81 : vector<16x1xf32> to vector<16x128xf32>
      %153 = arith.mulf %151, %152 : vector<16x128xf32>
      %c1_i32_41 = arith.constant 1 : i32
      %154 = tpu.dynamic_rotate %153 by %c1_i32_41 dim 1 : vector<16x128xf32>, i32 -> vector<16x128xf32>
      %155 = vector.broadcast %107 : vector<1x128xf32> to vector<16x128xf32>
      %156 = arith.mulf %154, %155 : vector<16x128xf32>
      %157 = arith.addf %150, %156 : vector<16x128xf32>
      %158 = vector.broadcast %109 : vector<1x128xf32> to vector<16x128xf32>
      %159 = arith.mulf %153, %158 : vector<16x128xf32>
      %160 = arith.addf %157, %159 : vector<16x128xf32>
      %c127_i32_42 = arith.constant 127 : i32
      %161 = tpu.dynamic_rotate %153 by %c127_i32_42 dim 1 : vector<16x128xf32>, i32 -> vector<16x128xf32>
      %162 = vector.broadcast %111 : vector<1x128xf32> to vector<16x128xf32>
      %163 = arith.mulf %161, %162 : vector<16x128xf32>
      %164 = arith.addf %160, %163 : vector<16x128xf32>
      %c1_i32_43 = arith.constant 1 : i32
      %165 = tpu.dynamic_rotate %arg8 by %c1_i32_43 dim 1 : vector<16x128xf32>, i32 -> vector<16x128xf32>
      %166 = vector.broadcast %58 : vector<1x128xf32> to vector<16x128xf32>
      %167 = arith.mulf %165, %166 : vector<16x128xf32>
      %168 = arith.addf %arg8, %167 : vector<16x128xf32>
      %c127_i32_44 = arith.constant 127 : i32
      %169 = tpu.dynamic_rotate %arg8 by %c127_i32_44 dim 1 : vector<16x128xf32>, i32 -> vector<16x128xf32>
      %170 = vector.broadcast %93 : vector<1x128xf32> to vector<16x128xf32>
      %171 = arith.mulf %169, %170 : vector<16x128xf32>
      %172 = arith.addf %168, %171 : vector<16x128xf32>
      %c1_i32_45 = arith.constant 1 : i32
      %173 = tpu.dynamic_rotate %172 by %c1_i32_45 dim 0 : vector<16x128xf32>, i32 -> vector<16x128xf32>
      %174 = vector.broadcast %46 : vector<16x1xf32> to vector<16x128xf32>
      %175 = arith.mulf %173, %174 : vector<16x128xf32>
      %176 = arith.addf %172, %175 : vector<16x128xf32>
      %c15_i32_46 = arith.constant 15 : i32
      %177 = tpu.dynamic_rotate %172 by %c15_i32_46 dim 0 : vector<16x128xf32>, i32 -> vector<16x128xf32>
      %178 = vector.broadcast %81 : vector<16x1xf32> to vector<16x128xf32>
      %179 = arith.mulf %177, %178 : vector<16x128xf32>
      %180 = arith.addf %176, %179 : vector<16x128xf32>
      %cst_47 = arith.constant 0.000000e+00 : f32
      %181 = vector.broadcast %cst_47 : f32 to vector<16x128xf32>
      %182 = arith.cmpf ogt, %180, %181 : vector<16x128xf32>
      %183 = arith.extui %182 : vector<16x128xi1> to vector<16x128xi32>
      %184 = arith.sitofp %183 : vector<16x128xi32> to vector<16x128xf32>
      %185 = arith.mulf %184, %11 : vector<16x128xf32>
      %186 = vector.shape_cast %185 : vector<16x128xf32> to vector<1x16x128xf32>
      %cst_48 = arith.constant dense<0.000000e+00> : vector<1xf32>
      %187 = vector.multi_reduction <add>, %186, %cst_48 [1, 2] : vector<1x16x128xf32> to vector<1xf32>
      %188 = vector.shape_cast %187 : vector<1xf32> to vector<1x1x1xf32>
      %189 = vector.extract %188[0, 0, 0] : f32 from vector<1x1x1xf32>
      %190 = vector.shape_cast %184 : vector<16x128xf32> to vector<1x16x128xf32>
      %cst_49 = arith.constant dense<0.000000e+00> : vector<1xf32>
      %191 = vector.multi_reduction <add>, %190, %cst_49 [1, 2] : vector<1x16x128xf32> to vector<1xf32>
      %192 = vector.shape_cast %191 : vector<1xf32> to vector<1x1x1xf32>
      %193 = vector.extract %192[0, 0, 0] : f32 from vector<1x1x1xf32>
      %194 = arith.cmpf oeq, %189, %15 : f32
      %195 = arith.cmpf oeq, %193, %arg10 : f32
      %196 = arith.ori %194, %195 : i1
      %197 = arith.extui %196 : i1 to i32
      %c1_i32_50 = arith.constant 1 : i32
      %198 = arith.addi %arg5, %c1_i32_50 : i32
      scf.yield %198, %197, %164, %184, %180, %193 : i32, i32, vector<16x128xf32>, vector<16x128xf32>, vector<16x128xf32>, f32
    }
    %cst_32 = arith.constant 0.000000e+00 : f32
    %119 = vector.broadcast %cst_32 : f32 to vector<16x128xf32>
    %120 = arith.cmpf oeq, %118#4, %119 : vector<16x128xf32>
    %cst_33 = arith.constant 1.000000e+00 : f32
    %121 = vector.broadcast %cst_33 : f32 to vector<16x128xf32>
    %122 = arith.select %120, %121, %118#4 : vector<16x128xi1>, vector<16x128xf32>
    %123 = arith.divf %118#2, %122 : vector<16x128xf32>
    %c0_34 = arith.constant 0 : index
    %c0_35 = arith.constant 0 : index
    %124 = vector.load %arg4[%c0_34, %c0_35] : memref<16x128xf32, #tpu.memory_space<vmem>>, vector<16x128xf32>
    tpu.vector_store %arg4[%c0_34, %c0_35], %123 {strides = array<i32>} : memref<16x128xf32, #tpu.memory_space<vmem>>, vector<16x128xf32>,
    return
  }
}

</mosaic_0001>

<bundles_post_ra>
// kernel: partial_conv_interpolation.1
= control target key start
LH: loop header
LB: loop body
LE: loop exit
PB: predicated region body
PF: predicated region fallthrough
CT: control target
= control target key end

     0   :  { %9 = vsyncpa [#allocation3], 0  ;;  %s513_s18 = smov [#allocation2]   ;;  %s791_s0 = inlined_call_operand.vmem [shape: f32[9], index: 0, kind: input, shape index: {}]   ;;  %s792_s1 = inlined_call_operand.vmem [shape: f32[16,128], index: 1, kind: input, shape index: {}]   ;;  %s793_s2 = inlined_call_operand.vmem [shape: f32[16,128], index: 2, kind: input, shape index: {}]   ;;  %s794_s3 = inlined_call_operand.vmem [shape: f32[16,128], index: 3, kind: input, shape index: {}]   ;;  %s795_s4 = inlined_call_operand.vmem [shape: f32[16,128], index: 4, kind: output, shape index: {}]  }
   0x1   :  { %s15_s17 = sshll.u32 %s791_s0, 4  ;;  %s16_s17 = int_to_ptr.vmem [resolvable:$true] %s15_s17 }
   0x2   :  { %18 = dma.vmem_to_smem %s16_s17, 16, %s513_s18, [#allocation3]  }
   0x3   :  { %487 = dma.done.wait [#allocation3], 16  }
   0x4   :  { %488 = vsyncadd [#allocation3], 4294967280 }
   0x5   :  { %29 = sfence }
   0x6   :  { %v549_v0 = vld [vmem:[%s794_s3] sm:$0xff]  ;;  %v554_v1 = vld [vmem:[%s794_s3 + $0x8] sm:$0xff]  ;;  %s584_s29 = sld [smem:[#allocation2 + $0x4]]  ;;  %v55_v10 = vlaneseq  ;;  %v514_v24 = vmov 0.0   ;;  %s655_s12 = smov 0  }
   0x7   :  { %v559_v2 = vld [vmem:[%s793_s2] sm:$0xff]   ;;  %v45_v3 = vadd.f32 %v554_v1, %v549_v0  ;;  %v566_v4 = vld [vmem:[%s793_s2 + $0x8] sm:$0xff]   ;;  %s582_s2 = sld [smem:[#allocation2 + $0x1]] }
   0x8   :  { %v39_v5 = vld [vmem:[%s792_s1] sm:$0xff]  ;;  %v40_v6 = vld [vmem:[%s792_s1 + $0x8] sm:$0xff]  ;;  %v137_v9 = vadd.f32 %v566_v4, %v559_v2  ;;  %s586_s30 = sld [smem:[#allocation2 + $0x7]]  ;;  %v602_v13 = vshrl.u32 %v55_v10, 7  ;;  %v59_v14 = vand.u32 127, %v55_v10 }
   0x9   :  { %v575_v7 = vmul.f32 %v559_v2, %v39_v5   ;;  %v578_v8 = vmul.f32 %v566_v4, %v40_v6   ;;  %46 = vadd.xlane.f32.xlu0 %v45_v3  ;;  %s588_s1 = sld [smem:[#allocation2]] }
   0xa   :  { %s590_s5 = sld [smem:[#allocation2 + $0x2]]  ;;  %v57_v16 = vadd.s32 8, %v602_v13  ;;  %v64_v17 = vand.u32 15, %v59_v14  ;;  %v73_v18 = vadd.s32 4294967295, %v602_v13 }
   0xb   :  { %s592_s6 = sld [smem:[#allocation2 + $0x3]] }
   0xc   :  { %s594_s7 = sld [smem:[#allocation2 + $0x5]]  ;;  %v125_v12 = vstv %s584_s29  ;;  %vm75_vm0 = vcmp.ge.s32.totalorder %v73_v18, 0  ;;  %v85_v21 = vadd.s32 4294967295, %v64_v17  ;;  %v99_v22 = vadd.s32 1, %v57_v16 }
   0xd   :  { %s596_s8 = sld [smem:[#allocation2 + $0x6]]  ;;  %v119_v11 = vstv %s582_s2  ;;  %v110_v23 = vadd.s32 1, %v64_v17  ;;  %v609_v25 = vsel %vm75_vm0, 1.0, %v514_v24 }
   0xe   :  { %s598_s9 = sld [smem:[#allocation2 + $0x8]]  ;;  %v131_v15 = vstv %s586_s30  ;;  %vm86_vm1 = vcmp.ge.s32.totalorder %v85_v21, 0  ;;  %vm103_vm2 = vcmp.lt.s32.totalorder %v99_v22, 16 }
   0xf   :  { %v117_v19 = vstv %s588_s1  ;;  %vm113_vm3 = vcmp.lt.s32.totalorder %v110_v23, 16  ;;  %v615_v30 = vsel %vm86_vm1, 1.0, %v514_v24  ;;  %v617_v31 = vsel %vm103_vm2, 1.0, %v514_v24 }
  0x10   :  { %v121_v20 = vstv %s590_s5  ;;  %v619_v32 = vsel %vm113_vm3, 1.0, %v514_v24  ;;  %v622_v33 = vmul.f32 %v615_v30, %v117_v19 }
  0x11   :  { %138 = vadd.xlane.f32.xlu0 %v137_v9  ;;  %v123_v26 = vstv %s592_s6  ;;  %v625_v34 = vmul.f32 %v619_v32, %v121_v20 }
  0x12   :  { %v127_v27 = vstv %s594_s7  ;;  %v628_v35 = vmul.f32 %v615_v30, %v123_v26 }
  0x13   :  { %v129_v28 = vstv %s596_s8  ;;  %v631_v36 = vmul.f32 %v619_v32, %v127_v27 }
  0x14   :  { %v133_v29 = vstv %s598_s9  ;;  %v634_v37 = vmul.f32 %v615_v30, %v129_v28 }
  0x15   :  { %v637_v38 = vmul.f32 %v619_v32, %v133_v29 }
  0x7c   :  { %v47_v39 = vpop.xlane.xlu0 %46 }
  0x7d   :  { %v48_v40 = vrot.slane %v47_v39, 4 }
  0x7f   :  { %v49_v41 = vadd.f32 %v48_v40, %v47_v39 }
  0x81   :  { %v50_v42 = vrot.slane %v49_v41, 2 }
  0x83   :  { %v51_v43 = vadd.f32 %v50_v42, %v49_v41 }
  0x84   :  { %v139_v44 = vpop.xlane.xlu0 %138 }
  0x85   :  { %v140_v45 = vrot.slane %v139_v44, 4  ;;  %v52_v46 = vrot.slane %v51_v43, 1 }
  0x87   :  { %v141_v47 = vadd.f32 %v140_v45, %v139_v44  ;;  %v53_v48 = vadd.f32 %v52_v46, %v51_v43 }
  0x89   :  { %v142_v49 = vrot.slane %v141_v47, 2  ;;  %386 = vpush %v53_v48 }
  0x8b   :  { %v143_v50 = vadd.f32 %v142_v49, %v141_v47 }
  0x8d   :  { %v144_v51 = vrot.slane %v143_v50, 1 }
  0x8f   :  { %v145_v52 = vadd.f32 %v144_v51, %v143_v50 }
  0x91   :  { %388 = vpush %v145_v52 }
  0xba   :  { %s639_s10 = spop %386 }
  0xc2   :  { %s389_s11 = spop %388  }
  0xc3 LB: > { %s515_s13 = smov 1   ;;  %s516_s14 = smov 127   ;;  %v163_v60 = vrot.slane %v507_v7, 7  ;;  %v164_v61 = vrot.slane %v503_v8, 7  ;;  %vm165_vm4 = vcmp.lt.s32.totalorder %v602_v13, 1  ;;  %vm212_vm5 = vcmp.lt.s32.totalorder %v602_v13, 7  ;;  %s511_s12 = sphi %s655_s12, %s800_s12   ;;  %v507_v7 = vphi %v575_v7, %v799_v7   ;;  %v503_v8 = vphi %v578_v8, %v798_v8   ;;  %v499_v2 = vphi %v559_v2, %v797_v2   ;;  %v495_v4 = vphi %v566_v4, %v703_v4   ;;  %s491_s11 = sphi %s389_s11, %s796_s11  }
  0xc4   : > { %237 = vrot.lane.b32.xlu0 %v499_v2, %s515_s13  ;;  %245 = vrot.lane.b32.xlu1 %v499_v2, %s516_s14  ;;  %v517_v29 = vmov 0.0   ;;  %v210_v43 = vrot.slane %v507_v7, 1  ;;  %v211_v44 = vrot.slane %v503_v8, 1  ;;  %s301_s15 = sadd.s32 1, %s511_s12  }
  0xc5   : > { %v166_v3 = vsel %vm165_vm4, %v163_v60, %v164_v61  ;;  %v167_v5 = vsel %vm165_vm4, %v164_v61, %v163_v60  ;;  %p157_p3 = scmp.lt.s32.totalorder %s301_s15, 20  ;;  %s800_s12 = smov %s301_s15 }
  0xc6   : > { %v213_v45 = vsel %vm212_vm5, %v210_v43, %v211_v44  ;;  %v214_v47 = vsel %vm212_vm5, %v211_v44, %v210_v43 }
  0xc7   : > { %v216_v48 = vmul.f32 %v617_v31, %v214_v47 }
  0xcc   : > { %239 = vrot.lane.b32.xlu0 %v495_v4, %s515_s13  ;;  %247 = vrot.lane.b32.xlu1 %v495_v4, %s516_s14 }
  0xd4   : > { %172 = vrot.lane.b32.xlu1 %v166_v3, %s515_s13 }
  0xdc   : > { %190 = vrot.lane.b32.xlu1 %v507_v7, %s515_s13 }
  0xe4   : > { %202 = vrot.lane.b32.xlu1 %v507_v7, %s516_s14 }
  0xec   : > { %217 = vrot.lane.b32.xlu1 %v213_v45, %s515_s13 }
  0xf4   : > { %231 = vrot.lane.b32.xlu1 %v216_v48, %s516_s14 }
 0x136   : > { %v238_v53 = vpop.permute.xlu0 %237  ;;  %v246_v54 = vpop.permute.xlu1 %245 }
 0x137   : > { %v241_v55 = vmul.f32 %v615_v30, %v238_v53  ;;  %v249_v57 = vmul.f32 %v619_v32, %v246_v54 }
 0x139   : > { %v243_v56 = vadd.f32 %v499_v2, %v241_v55  ;;  %v684_v2 = vmul.f32 %v609_v25, %v167_v5  ;;  %v179_v55 = vmul.f32 %v166_v3, %v119_v11 }
 0x13b   : > { %v251_v6 = vadd.f32 %v249_v57, %v243_v56  ;;  %170 = vrot.lane.b32.xlu0 %v684_v2, %s515_s13 }
 0x13d   : > { %v253_v14 = vrot.slane %v251_v6, 7  ;;  %v261_v16 = vrot.slane %v251_v6, 1 }
 0x13e   : > { %v240_v58 = vpop.permute.xlu0 %239  ;;  %v248_v59 = vpop.permute.xlu1 %247 }
 0x13f   : > { %v242_v62 = vmul.f32 %v615_v30, %v240_v58  ;;  %v250_v63 = vmul.f32 %v619_v32, %v248_v59 }
 0x141   : > { %v244_v9 = vadd.f32 %v495_v4, %v242_v62 }
 0x143   : > { %v252_v10 = vadd.f32 %v250_v63, %v244_v9  ;;  %184 = vrot.lane.b32.xlu0 %v166_v3, %s516_s14 }
 0x145   : > { %v254_v17 = vrot.slane %v252_v10, 7  ;;  %v262_v18 = vrot.slane %v252_v10, 1 }
 0x146   : > { %v173_v49 = vpop.permute.xlu1 %172 }
 0x147   : > { %v255_v19 = vsel %vm165_vm4, %v253_v14, %v254_v17  ;;  %v256_v20 = vsel %vm165_vm4, %v254_v17, %v253_v14  ;;  %v264_v4 = vsel %vm212_vm5, %v262_v18, %v261_v16  ;;  %v263_v27 = vsel %vm212_vm5, %v261_v16, %v262_v18 }
 0x148   : > { %v257_v21 = vmul.f32 %v609_v25, %v256_v20  ;;  %v260_v22 = vadd.f32 %v255_v19, %v252_v10  ;;  %v266_v23 = vmul.f32 %v617_v31, %v264_v4  ;;  %v175_v57 = vmul.f32 %v173_v49, %v622_v33 }
 0x149   : > { %v178_v10 = vmul.f32 %v684_v2, %v119_v11 }
 0x14a   : > { %v259_v24 = vadd.f32 %v257_v21, %v251_v6  ;;  %v695_v26 = vadd.f32 %v266_v23, %v260_v22  ;;  %v181_v62 = vadd.f32 %v179_v55, %v175_v57 }
 0x14b   : > { %192 = vrot.lane.b32.xlu0 %v503_v8, %s515_s13 }
 0x14c   : > { %v700_v28 = vadd.f32 %v263_v27, %v259_v24  ;;  %vm270_vm6 = vcmp.gt.f32.partialorder %v695_v26, 0.0  ;;  %v199_v27 = vmul.f32 %v503_v8, %v125_v12 }
 0x14d   : > { %v703_v4 = vsel %vm270_vm6, 1.0, %v517_v29  }
 0x14e   : > { %vm269_vm7 = vcmp.gt.f32.partialorder %v700_v28, 0.0  ;;  %v276_v41 = vmul.f32 %v703_v4, %v554_v1  ;;  %v191_v51 = vpop.permute.xlu1 %190 }
 0x14f   : > { %v706_v39 = vsel %vm269_vm7, 1.0, %v517_v29  }
 0x150   : > { %v275_v40 = vmul.f32 %v706_v39, %v549_v0  ;;  %v287_v46 = vadd.f32 %v703_v4, %v706_v39 }
 0x152   : > { %v277_v42 = vadd.f32 %v276_v41, %v275_v40  ;;  %v194_v40 = vmul.f32 %v191_v51, %v628_v35 }
 0x153   : > { %204 = vrot.lane.b32.xlu0 %v503_v8, %s516_s14 }
 0x154   : > { %278 = vadd.xlane.f32.xlu2 %v277_v42  ;;  %v198_v42 = vmul.f32 %v507_v7, %v125_v12  ;;  %v225_v7 = vmul.f32 %v213_v45, %v131_v15 }
 0x156   : > { %v203_v59 = vpop.permute.xlu1 %202 }
 0x157   : > { %v206_v49 = vmul.f32 %v203_v59, %v631_v36 }
 0x15b   : > { %229 = vrot.lane.b32.xlu0 %v213_v45, %s516_s14 }
 0x15c   : > { %288 = vadd.xlane.f32.xlu2 %v287_v46 }
 0x15e   : > { %v218_v20 = vpop.permute.xlu1 %217 }
 0x174   : > { %182 = vrot.lane.b32.xlu2 %v684_v2, %s516_s14 }
 0x17c   : > { %219 = vrot.lane.b32.xlu2 %v216_v48, %s515_s13 }
 0x1ad   : > { %v171_v50 = vpop.permute.xlu0 %170 }
 0x1ae   : > { %v174_v14 = vmul.f32 %v171_v50, %v622_v33 }
 0x1b0   : > { %v180_v23 = vadd.f32 %v178_v10, %v174_v14 }
 0x1b5   : > { %v185_v52 = vpop.permute.xlu0 %184 }
 0x1b6   : > { %v187_v63 = vmul.f32 %v185_v52, %v625_v34  ;;  %v221_v52 = vmul.f32 %v218_v20, %v634_v37 }
 0x1b8   : > { %v189_v17 = vadd.f32 %v187_v63, %v181_v62 }
 0x1bd   : > { %v193_v60 = vpop.permute.xlu0 %192 }
 0x1be   : > { %v195_v18 = vmul.f32 %v193_v60, %v628_v35 }
 0x1c0   : > { %v197_v24 = vadd.f32 %v195_v18, %v189_v17 }
 0x1c2   : > { %v201_v46 = vadd.f32 %v199_v27, %v197_v24 }
 0x1c5   : > { %v205_v21 = vpop.permute.xlu0 %204 }
 0x1c6   : > { %v207_v47 = vmul.f32 %v205_v21, %v631_v36 }
 0x1c7   : > { %v279_v53 = vpop.xlane.xlu2 %278 }
 0x1c8   : > { %v280_v54 = vrot.slane %v279_v53, 4  ;;  %v209_v51 = vadd.f32 %v207_v47, %v201_v46 }
 0x1ca   : > { %v281_v56 = vadd.f32 %v280_v54, %v279_v53  ;;  %v232_v53 = vpop.permute.xlu1 %231 }
 0x1cb   : > { %v234_v59 = vmul.f32 %v232_v53, %v637_v38 }
 0x1cc   : > { %v282_v58 = vrot.slane %v281_v56, 2 }
 0x1cd   : > { %v230_v55 = vpop.permute.xlu0 %229 }
 0x1ce   : > { %v283_v61 = vadd.f32 %v282_v58, %v281_v56  ;;  %v226_v58 = vmul.f32 %v216_v48, %v131_v15  ;;  %v233_v62 = vmul.f32 %v230_v55, %v637_v38 }
 0x1cf   : > { %v289_v5 = vpop.xlane.xlu2 %288 }
 0x1d0   : > { %v290_v6 = vrot.slane %v289_v5, 4  ;;  %v284_v9 = vrot.slane %v283_v61, 1 }
 0x1d2   : > { %v291_v3 = vadd.f32 %v290_v6, %v289_v5  ;;  %v285_v16 = vadd.f32 %v284_v9, %v283_v61 }
 0x1d4   : > { %v292_v19 = vrot.slane %v291_v3, 2  ;;  %390 = vpush %v285_v16 }
 0x1d6   : > { %v293_v22 = vadd.f32 %v292_v19, %v291_v3 }
 0x1d7   : > { %v183_v29 = vpop.permute.xlu2 %182 }
 0x1d8   : > { %v294_v2 = vrot.slane %v293_v22, 1  ;;  %v186_v41 = vmul.f32 %v183_v29, %v625_v34 }
 0x1da   : > { %v295_v43 = vadd.f32 %v294_v2, %v293_v22  ;;  %v188_v44 = vadd.f32 %v186_v41, %v180_v23  ;;  %v797_v2 = vmov %v706_v39 }
 0x1dc   : > { %392 = vpush %v295_v43  ;;  %v196_v8 = vadd.f32 %v194_v40, %v188_v44 }
 0x1de   : > { %v200_v50 = vadd.f32 %v198_v42, %v196_v8 }
 0x1df   : > { %v220_v54 = vpop.permute.xlu2 %219 }
 0x1e0   : > { %v208_v56 = vadd.f32 %v206_v49, %v200_v50  ;;  %v222_v57 = vmul.f32 %v220_v54, %v634_v37 }
 0x1e2   : > { %v223_v60 = vadd.f32 %v221_v52, %v208_v56  ;;  %v224_v61 = vadd.f32 %v222_v57, %v209_v51 }
 0x1e4   : > { %v228_v63 = vadd.f32 %v226_v58, %v224_v61  ;;  %v227_v5 = vadd.f32 %v225_v7, %v223_v60 }
 0x1e6   : > { %v236_v6 = vadd.f32 %v234_v59, %v228_v63   ;;  %v235_v9 = vadd.f32 %v233_v62, %v227_v5  }
 0x1e8   : > { %v798_v8 = vmov %v236_v6  ;;  %v799_v7 = vmov %v235_v9 }
 0x205   : > { %s391_s16 = spop %390 }
 0x206   : > { %p297_p0 = scmp.eq.f32.partialorder %s391_s16, %s639_s10 }
 0x20d   : > { %s393_s17 = spop %392  }
 0x20e   : > { %p298_p1 = scmp.eq.f32.partialorder %s393_s17, %s491_s11  ;;  %s796_s11 = smov %s393_s17 }
 0x210   : > { %p299_p2 = por %p298_p1, %p297_p0 }
 0x212   : > { %s300_s18 = scalar_select %p299_p2, 1, 0 }
 0x214   : > { %p158_p4 = scmp.eq.s32.totalorder %s300_s18, 0 }
 0x216   : > { %p159_p5 = pnand %p158_p4, %p157_p3 }
 0x217   :  { %vm302_vm8 = vcmp.eq.f32.partialorder (%p159_p5), %v700_v28, 0.0  ;;  %vm303_vm9 = vcmp.eq.f32.partialorder (%p159_p5), %v695_v26, 0.0 }
 0x218   :  { %162 = sbr.rel (!%p159_p5) target bundleno = 195 (0xc3), region = 47  ;;  %v304_v45 = vsel (%p159_p5), %vm302_vm8, 1.0, %v700_v28  ;;  %v305_v48 = vsel (%p159_p5), %vm303_vm9, 1.0, %v695_v26 }
 0x219   :  { %447 = vrcp.f32 (%p159_p5), %v304_v45  ;;  %vm311_vm10 = vweird.f32 (%p159_p5), %v304_v45  ;;  %v317_v3 = vand.u32 (%p159_p5), 2147483648, %v304_v45  ;;  %v315_v18 = vand.u32 (%p159_p5), 2147483647, %v304_v45 }
 0x21a   :  { %449 = vrcp.f32 (%p159_p5), %v305_v48  ;;  %v332_v19 = vand.u32 (%p159_p5), 2147483648, %v305_v48  ;;  %vm326_vm12 = vweird.f32 (%p159_p5), %v305_v48  ;;  %v330_v1 = vand.u32 (%p159_p5), 2147483647, %v305_v48 }
 0x21b   :  { %v318_v12 = vor.u32 (%p159_p5), 1.1754944e-38, %v317_v3  ;;  %vm316_vm15 = vcmp.eq.f32.partialorder (%p159_p5), %v315_v18, 8.507059e+37 }
 0x21c   :  { %v333_v25 = vor.u32 (%p159_p5), 1.1754944e-38, %v332_v19  ;;  %vm331_vm1 = vcmp.eq.f32.partialorder (%p159_p5), %v330_v1, 8.507059e+37 }
 0x21f   :  { %v448_v10 = vpop.eup %447 }
 0x220   :  { %v450_v39 = vpop.eup %449  ;;  %v307_v14 = vmul.f32 %v448_v10, %v304_v45  ;;  %vm312_vm11 = vweird.f32 %v448_v10 }
 0x221   :  { %v322_v16 = vmul.f32 %v450_v39, %v305_v48  ;;  %vm327_vm13 = vweird.f32 %v450_v39  ;;  %vm313_vm14 = vmor %vm311_vm10, %vm312_vm11 }
 0x222   :  { %v308_v17 = vsub.f32 1.0, %v307_v14  ;;  %vm328_vm0 = vmor %vm326_vm12, %vm327_vm13 }
 0x223   :  { %v323_v0 = vsub.f32 1.0, %v322_v16 }
 0x224   :  { %v309_v11 = vmul.f32 %v448_v10, %v308_v17 }
 0x225   :  { %v324_v13 = vmul.f32 %v450_v39, %v323_v0 }
 0x226   :  { %v310_v15 = vadd.f32 %v448_v10, %v309_v11 }
 0x227   :  { %v325_v30 = vadd.f32 %v450_v39, %v324_v13 }
 0x228   :  { %v314_v31 = vsel %vm313_vm14, %v448_v10, %v310_v15 }
 0x229   :  { %v319_v32 = vsel %vm316_vm15, %v318_v12, %v314_v31  ;;  %v329_v33 = vsel %vm328_vm0, %v450_v39, %v325_v30 }
 0x22a   :  { %v320_v34 = vmul.f32 %v319_v32, %v235_v9  ;;  %v334_v35 = vsel %vm331_vm1, %v333_v25, %v329_v33 }
 0x22b   :  { %v335_v36 = vmul.f32 %v334_v35, %v236_v6 }
 0x22c   :  { %336 = vst [vmem:[%s795_s4] sm:$0xff] %v320_v34 }
 0x22d   :  { %337 = vst [vmem:[%s795_s4 + $0x8] sm:$0xff] %v335_v36 }
 0x22e   :  { %342 = vsyncpa [#allocation3], 1 }

</bundles_post_ra>
